<compile_context>
chip_gen: v7x
topology: tpu7x:2x2x1
jax: 0.10.0
libtpu: 0.0.40
codegen_flags: <defaults>
</compile_context>

<pallas_src>
import math

import jax
import jax.numpy as jnp
from jax.experimental import pallas as pl
from jax.experimental.pallas import tpu as pltpu

# Horner-form constants with the sigmoid->tanh 0.5 folded in:
#   sigmoid(t) = 0.5*(tanh(0.5*t) + 1)
#   0.5 * (sqrt(2/pi)*x + 0.044715*x^3) = x * (_C1 + _C2 * x*x)
_C1 = 0.5 * math.sqrt(2.0 / math.pi)
_C2 = 0.5 * 0.044715

_SMALL_BYTES = 1 * 1024 * 1024   # below this, a single block (overhead-bound anyway)
_MIN_BLOCKS = 8                  # pipelining + v7x megacore friendliness


def _sielu_kernel(x_ref, o_ref):
    xf = x_ref[...].astype(jnp.float32)
    # ~7 VALU ops/elem + 1 EUP tanh: Horner cubic, 0.5 pre-folded into constants.
    u = xf * (_C1 + _C2 * (xf * xf))
    o_ref[...] = (xf * (0.5 * jnp.tanh(u) + 0.5)).astype(o_ref.dtype)
    # TODO(synk): optional bf16-compute path for bf16 I/O on v6e/v7x if the
    # EUP/VALU slots ever become binding; kept f32 for exactness on all gens.


def _sielu_jnp(x: jax.Array) -> jax.Array:
    """Plain-jnp path for tiny tails (< 128 elements)."""
    xf = x.astype(jnp.float32)
    u = xf * (_C1 + _C2 * (xf * xf))
    return (xf * (0.5 * jnp.tanh(u) + 0.5)).astype(x.dtype)


def _sielu_flat_aligned(x_flat: jax.Array, target_block_bytes: int) -> jax.Array:
    """Kernel on a flat array whose length is a multiple of 128."""
    n = x_flat.size
    dtype = x_flat.dtype
    itemsize = jnp.dtype(dtype).itemsize

    # Wide, lane-dense last dim (no padding: n % 128 == 0 guaranteed).
    if n % 1024 == 0:
        w = 1024
    elif n % 512 == 0:
        w = 512
    elif n % 256 == 0:
        w = 256
    else:
        w = 128
    rows = n // w
    x2d = x_flat.reshape(rows, w)

    # Sublane alignment for the dtype (8 f32 / 16 bf16 / 32 int8).
    sublane_mult = max(8, 32 // itemsize)
    total_bytes = n * itemsize

    if total_bytes <= _SMALL_BYTES or rows <= sublane_mult:
        # Tiny input: a single full-extent block (always legal).
        block_rows = rows
    else:
        # Cap at ~target_block_bytes per block, but never fewer than
        # _MIN_BLOCKS grid steps so DMA in/out overlap and v7x can shard the
        # "parallel" axis across both TensorCores.
        max_rows = max(
            sublane_mult,
            (target_block_bytes // (w * itemsize)) // sublane_mult * sublane_mult,
        )
        rows_for_min_blocks = max(
            sublane_mult,
            (rows // _MIN_BLOCKS) // sublane_mult * sublane_mult,
        )
        block_rows = min(max_rows, rows_for_min_blocks)
        if block_rows >= rows:
            block_rows = rows
    num_blocks = pl.cdiv(rows, block_rows)

    # VMEM budget from actual resident footprint:
    #   2 arrays (in + out) x 2 buffers (double-buffering) x block + headroom.
    block_bytes = block_rows * w * itemsize
    vmem_limit = min(48 * 1024 * 1024, max(16 * 1024 * 1024, 4 * block_bytes + 8 * 1024 * 1024))

    cost = pl.CostEstimate(
        flops=7 * n,
        transcendentals=n,
        bytes_accessed=2 * n * itemsize,
    )

    out2d = pl.pallas_call(
        _sielu_kernel,
        out_shape=jax.ShapeDtypeStruct((rows, w), dtype),
        grid_spec=pltpu.PrefetchScalarGridSpec(
            num_scalar_prefetch=0,
            grid=(num_blocks,),
            in_specs=[pl.BlockSpec((block_rows, w), lambda i: (i, 0))],
            out_specs=pl.BlockSpec((block_rows, w), lambda i: (i, 0)),
        ),
        compiler_params=pltpu.CompilerParams(
            dimension_semantics=("parallel",),
            vmem_limit_bytes=vmem_limit,
        ),
        cost_estimate=cost,
    )(x2d)

    return out2d.reshape(-1)


def sielu(x: jax.Array, *, target_block_bytes: int = 4 * 1024 * 1024) -> jax.Array:
    """Elementwise SiELU on an array of any shape / float dtype."""
    orig_shape = x.shape
    n = x.size
    if n == 0:
        return x

    x_flat = x.reshape(-1)
    n_main = (n // 128) * 128
    tail = n - n_main

    if n_main == 0:
        # Entire array smaller than one lane row: plain jnp, no kernel launch.
        return _sielu_jnp(x_flat).reshape(orig_shape)

    if tail == 0:
        out_flat = _sielu_flat_aligned(x_flat, target_block_bytes)
    else:
        # Aligned prefix through the kernel; tiny (<128 elem) tail in plain jnp.
        out_main = _sielu_flat_aligned(x_flat[:n_main], target_block_bytes)
        out_tail = _sielu_jnp(x_flat[n_main:])
        out_flat = jnp.concatenate([out_main, out_tail])

    return out_flat.reshape(orig_shape)


def sielu_ref(x: jax.Array) -> jax.Array:
    xf = x.astype(jnp.float32)
    inner = math.sqrt(2.0 / math.pi) * xf + 0.044715 * xf ** 3
    return (xf * jax.nn.sigmoid(inner)).astype(x.dtype)


if __name__ == "__main__":
    key = jax.random.PRNGKey(0)

    # Primary small test matching the module's elementwise (*) semantics.
    x = jax.random.normal(key, (2, 4, 16, 16), dtype=jnp.float32)
    out = jax.block_until_ready(sielu(x))
    ref = sielu_ref(x)
    assert out.shape == x.shape and out.dtype == x.dtype
    assert jnp.allclose(out, ref, atol=1e-5, rtol=1e-5), "mismatch vs reference (aligned)"

    # Ragged total size (< 128 elements): pure-jnp fallback path.
    x2 = jax.random.normal(jax.random.PRNGKey(1), (3, 5, 7), dtype=jnp.float32)
    out2 = jax.block_until_ready(sielu(x2))
    assert jnp.allclose(out2, sielu_ref(x2), atol=1e-5, rtol=1e-5), "mismatch (tiny ragged)"

    # Ragged total size (> 128, not a multiple of 128): kernel prefix + jnp tail.
    x3 = jax.random.normal(jax.random.PRNGKey(2), (257, 130), dtype=jnp.float32)
    out3 = jax.block_until_ready(sielu(x3))
    assert jnp.allclose(out3, sielu_ref(x3), atol=1e-5, rtol=1e-5), "mismatch (ragged prefix+tail)"

    # Medium aligned input (~2 MiB): exercises the multi-block (>= 8 steps) path.
    x4 = jax.random.normal(jax.random.PRNGKey(3), (256, 2048), dtype=jnp.float32)
    out4 = jax.block_until_ready(sielu(x4))
    assert jnp.allclose(out4, sielu_ref(x4), atol=1e-5, rtol=1e-5), "mismatch (multi-block)"

    print("KERNEL_OK")
</pallas_src>

<mosaic_0001>
module attributes {stable_mosaic.version = 11 : i64} {
  func.func @_sielu_kernel(%arg0: i32, %arg1: memref<2x1024xf32, #tpu.memory_space<vmem>>, %arg2: memref<2x1024xf32, #tpu.memory_space<vmem>>) attributes {dimension_semantics = [#tpu.dimension_semantics<parallel>], iteration_bounds = array<i64: 1>, scalar_prefetch = 0 : i64, scratch_operands = 0 : i64, tpu.core_type = #tpu.core_type<tc>, window_params = [{transform_indices = @transform_0, window_bounds = array<i64: 2, 1024>}, {transform_indices = @transform_1, window_bounds = array<i64: 2, 1024>}]} {
    %c0 = arith.constant 0 : index
    %c0_0 = arith.constant 0 : index
    %0 = vector.load %arg1[%c0, %c0_0] : memref<2x1024xf32, #tpu.memory_space<vmem>>, vector<2x1024xf32>
    %1 = arith.mulf %0, %0 : vector<2x1024xf32>
    %cst = arith.constant 2.235750e-02 : f32
    %2 = vector.broadcast %cst : f32 to vector<2x1024xf32>
    %3 = arith.mulf %2, %1 : vector<2x1024xf32>
    %cst_1 = arith.constant 0.398942292 : f32
    %4 = vector.broadcast %cst_1 : f32 to vector<2x1024xf32>
    %5 = arith.addf %4, %3 : vector<2x1024xf32>
    %6 = arith.mulf %0, %5 : vector<2x1024xf32>
    %7 = math.tanh %6 : vector<2x1024xf32>
    %cst_2 = arith.constant 5.000000e-01 : f32
    %8 = vector.broadcast %cst_2 : f32 to vector<2x1024xf32>
    %9 = arith.mulf %8, %7 : vector<2x1024xf32>
    %cst_3 = arith.constant 5.000000e-01 : f32
    %10 = vector.broadcast %cst_3 : f32 to vector<2x1024xf32>
    %11 = arith.addf %9, %10 : vector<2x1024xf32>
    %12 = arith.mulf %0, %11 : vector<2x1024xf32>
    %c0_4 = arith.constant 0 : index
    %c0_5 = arith.constant 0 : index
    %13 = vector.load %arg2[%c0_4, %c0_5] : memref<2x1024xf32, #tpu.memory_space<vmem>>, vector<2x1024xf32>
    tpu.vector_store %arg2[%c0_4, %c0_5], %12 {strides = array<i32>} : memref<2x1024xf32, #tpu.memory_space<vmem>>, vector<2x1024xf32>,
    return
  }
  func.func @transform_0(%arg0: i32) -> (i32, i32) {
    %c0_i32 = arith.constant 0 : i32
    %c0_i32_0 = arith.constant 0 : i32
    return %arg0, %c0_i32 : i32, i32
  }
  func.func @transform_1(%arg0: i32) -> (i32, i32) {
    %c0_i32 = arith.constant 0 : i32
    %c0_i32_0 = arith.constant 0 : i32
    return %arg0, %c0_i32 : i32, i32
  }
}

</mosaic_0001>

<bundles_post_ra>
// kernel: tpu_custom_call.1
= control target key start
LH: loop header
LB: loop body
LE: loop exit
PB: predicated region body
PF: predicated region fallthrough
CT: control target
= control target key end

     0   :  { %6 = vsyncpa [#allocation3], 0  ;;  %s146_s0 = inlined_call_operand.hbm [shape: f32[2,1024], index: 0, kind: input, shape index: {}]   ;;  %s147_s1 = inlined_call_operand.hbm [shape: f32[2,1024], index: 1, kind: output, shape index: {}]  }
   0x1   :  { %7 = vsyncpa [#allocation4], 0  ;;  %s110_s6 = smov [#allocation2]   ;;  %s62_s10 = scalar_lea.hbm %s146_s0, 256 }
   0x2   :  { %s14_s7 = sshll.u32 %s110_s6, 4  ;;  %p63_p0 = scmp.ne.s32.totalorder %s146_s0, %s62_s10  ;;  %s15_s7 = int_to_ptr.vmem [resolvable:$true] %s14_s7 }
   0x3   :  { %p66_p1 = scmp.lt.u32.totalorder %s62_s10, %s146_s0 }
   0x5   :  { %p68_p2 = pnand %p66_p1, %p63_p0 }
   0x7   :  { %71 = shalt.err (!%p68_p2)
}
   0x8   :  { %s72_s15 = scalar_lea.vmem %s15_s7, 256  ;;  %p77_p4 = scmp.lt.s32.totalorder %s15_s7, %s15_s7 }
   0x9   :  { %p73_p3 = scmp.ne.s32.totalorder %s15_s7, %s72_s15  ;;  %p78_p5 = scmp.lt.s32.totalorder %s72_s15, %s72_s15 }
   0xb   :  { %p79_p6 = por %p78_p5, %p77_p4 }
   0xd   :  { %p80_p7 = pnand %p79_p6, %p73_p3 }
   0xf   :  { %83 = shalt.err (!%p80_p7)
}
  0x10   :  { %17 = dma.hbm_to_vmem [thread:$0]  %s146_s0, 256, %s15_s7, [#allocation3]  }
  0x11   :  { %106 = dma.done.wait [#allocation3], 256  }
  0x12   :  { %107 = vsyncadd [#allocation3], 4294967040  ;;  %v21_v0 = vld [vmem:[#allocation2] sm:$0xff]  ;;  %v22_v1 = vld [vmem:[#allocation2 + $0x8] sm:$0xff]  ;;  %s111_s0 = smov [#allocation5]  }
  0x13   :  { %v23_v2 = vmul.f32 %v21_v0, %v21_v0  ;;  %v24_v3 = vmul.f32 %v22_v1, %v22_v1  ;;  %s47_s18 = sshll.u32 %s111_s0, 4  ;;  %s48_s18 = int_to_ptr.vmem [resolvable:$true] %s47_s18 }
  0x14   :  { %s84_s19 = scalar_lea.vmem %s48_s18, 256  ;;  %p89_p9 = scmp.lt.s32.totalorder %s48_s18, %s48_s18 }
  0x15   :  { %v25_v4 = vmul.f32 0.0223575, %v23_v2  ;;  %v26_v5 = vmul.f32 0.0223575, %v24_v3  ;;  %p85_p8 = scmp.ne.s32.totalorder %s48_s18, %s84_s19  ;;  %p90_p10 = scmp.lt.s32.totalorder %s84_s19, %s84_s19 }
  0x17   :  { %v27_v6 = vadd.f32 0.3989423, %v25_v4  ;;  %v28_v7 = vadd.f32 0.3989423, %v26_v5  ;;  %p91_p11 = por %p90_p10, %p89_p9 }
  0x19   :  { %v29_v8 = vmul.f32 %v27_v6, %v21_v0  ;;  %v30_v9 = vmul.f32 %v28_v7, %v22_v1  ;;  %p92_p12 = pnand %p91_p11, %p85_p8 }
  0x1b   :  { %58 = vtanh.f32 %v29_v8 }
  0x1c   :  { %60 = vtanh.f32 %v30_v9 }
  0x25   :  { %v59_v10 = vpop.eup %58 }
  0x26   :  { %v61_v11 = vpop.eup %60  ;;  %v33_v12 = vmul.f32 0.5, %v59_v10 }
  0x27   :  { %v34_v13 = vmul.f32 0.5, %v61_v11 }
  0x28   :  { %v35_v14 = vadd.f32 0.5, %v33_v12 }
  0x29   :  { %v36_v15 = vadd.f32 0.5, %v34_v13 }
  0x2a   :  { %v37_v16 = vmul.f32 %v35_v14, %v21_v0 }
  0x2b   :  { %v38_v17 = vmul.f32 %v36_v15, %v22_v1 }
  0x2c   :  { %39 = vst [vmem:[#allocation5] sm:$0xff] %v37_v16 }
  0x2d   :  { %40 = vst [vmem:[#allocation5 + $0x8] sm:$0xff] %v38_v17 }
  0x2e   :  { %95 = shalt.err (!%p92_p12)
}
  0x2f   :  { %s96_s22 = scalar_lea.hbm %s147_s1, 256 }
  0x30   :  { %p97_p13 = scmp.ne.s32.totalorder %s147_s1, %s96_s22  ;;  %p100_p0 = scmp.lt.u32.totalorder %s96_s22, %s147_s1 }
  0x32   :  { %p102_p1 = pnand %p100_p0, %p97_p13 }
  0x34   :  { %105 = shalt.err (!%p102_p1)
}
  0x35   :  { %50 = dma.vmem_to_hbm [thread:$0]  %s48_s18, 256, %s147_s1, [#allocation4]  }
  0x36   :  { %108 = dma.done.wait [#allocation4], 256  }
  0x37   :  { %109 = vsyncadd [#allocation4], 4294967040 }
  0x38   :  { %54 = vsyncpa [#allocation3], 1 }
  0x39   :  { %55 = vsyncpa [#allocation4], 1 }

</bundles_post_ra>
